<compile_context>
chip_gen: v6e
topology: v6e:2x2x1
jax: 0.10.0
libtpu: 0.0.40
codegen_flags: <defaults>
</compile_context>

<pallas_src>
import functools

import jax
import jax.numpy as jnp
from jax.experimental import pallas as pl
from jax.experimental.pallas import tpu as pltpu


def _round_up(x, m):
    return ((x + m - 1) // m) * m


def _largest_divisor_at_most(n, cap):
    cap = max(1, min(n, cap))
    for d in range(cap, 0, -1):
        if n % d == 0:
            return d
    return 1


def _tpu_generation_params():
    """Per-generation tuning: (tensorcores_per_chip, vmem_cap_bytes, block_budget_bytes)."""
    kind = ""
    try:
        kind = jax.devices()[0].device_kind.lower()
    except Exception:
        pass
    if "v7" in kind or "7x" in kind:
        # v7x: 2 TCs/chip, 64 MiB VMEM per TC -> smaller blocks, >=2 steps/core.
        return 2, 56 * 1024 * 1024, 5 * 1024 * 1024
    # v5e / v6e (and unknown): 1 TC/chip, 128 MiB VMEM -> big blocks, no step clamp.
    return 1, 96 * 1024 * 1024, 8 * 1024 * 1024


def _sge_kernel(x_ref, w_ref, b_ref, o_ref, *, inv_hw, inv_nm1):
    """One grid step: a (bg_blk, cg, hw) slab.

    x_ref, o_ref : VMEM (bg_blk, cg, hw)   input / gated output (I/O dtype)
    w_ref, b_ref : VMEM (bg_blk, 1)        per-(batch, group) affine params
    """
    xf = x_ref[...].astype(jnp.float32)                        # (BG, cg, hw)

    # adaptive avg pool: per-channel spatial mean
    ch_mean = jnp.sum(xf, axis=-1, keepdims=True) * inv_hw     # (BG, cg, 1)

    # channel-weighted spatial map, summed over the group's channels
    xn = jnp.sum(xf * ch_mean, axis=1)                         # (BG, hw)
    del xf  # keep the full-slab f32 copy's live range short (re-read at store)

    # standardize over spatial positions (unbiased std, ddof=1)
    xn_mean = jnp.sum(xn, axis=-1, keepdims=True) * inv_hw     # (BG, 1)
    t = xn - xn_mean
    var = jnp.sum(t * t, axis=-1, keepdims=True) * inv_nm1
    # NOTE: eps placement matches PyTorch's `t / (t.std() + 1e-5)`; do not
    # replace with rsqrt(var + eps).
    t = t / (jnp.sqrt(var) + 1e-5)

    # per-(batch, group) affine + sigmoid gate, broadcast over channels
    wv = w_ref[...].astype(jnp.float32)                        # (BG, 1)
    bv = b_ref[...].astype(jnp.float32)
    gate = jax.nn.sigmoid(t * wv + bv)                         # (BG, hw)

    o_ref[...] = (x_ref[...].astype(jnp.float32)
                  * gate[:, None, :]).astype(o_ref.dtype)


def sge_reference(x, weight, bias, groups):
    """Pure-JAX transcription of the PyTorch forward, for verification."""
    b, c, h, w = x.shape
    xg = x.reshape(b * groups, c // groups, h, w)
    avg = jnp.mean(xg, axis=(2, 3), keepdims=True)
    xn = jnp.sum(xg * avg, axis=1, keepdims=True)
    t = xn.reshape(b * groups, -1)
    t = t - jnp.mean(t, axis=1, keepdims=True)
    std = jnp.std(t, axis=1, keepdims=True, ddof=1) + 1e-5
    t = t / std
    t = t.reshape(b, groups, h, w)
    t = t * weight + bias
    t = t.reshape(b * groups, 1, h, w)
    out = xg * jax.nn.sigmoid(t)
    return out.reshape(b, c, h, w)


def spatial_group_enhance(x, weight, bias, groups):
    """x: (b, c, h, w) NCHW (f32 or bf16); weight, bias: (1, groups, 1, 1)."""
    b, c, h, w = x.shape
    assert c % groups == 0, "channels must be divisible by groups"
    cg = c // groups
    bg = b * groups
    hw = h * w
    itemsize = jnp.dtype(x.dtype).itemsize

    cores, vmem_cap, block_budget = _tpu_generation_params()

    # VMEM footprint of one (cg, hw) slab (tiles are padded to (8, 128) in
    # VMEM even though the DMA only moves the real bytes).
    slab_io = _round_up(cg, 8) * _round_up(hw, 128) * itemsize
    slab_f32 = _round_up(cg, 8) * _round_up(hw, 128) * 4

    # Per-slab VMEM need: 2x double-buffered input + 2x output (I/O dtype)
    # plus the transient in-kernel f32 copy / products.
    per_bg_vmem = 4 * slab_io + 2 * slab_f32
    if per_bg_vmem > vmem_cap:
        # TODO(synk): add an hw-tiled two-pass kernel (stats pass, then gate
        # pass) for very large feature maps; fall back to plain XLA for now.
        return sge_reference(x.astype(jnp.float32), weight, bias,
                             groups).astype(x.dtype)

    # --- pick how many (batch, group) slabs to fuse per grid step -----------
    cap = max(1, block_budget // max(slab_io, 1))
    if cores >= 2 and bg >= 2:
        # >= 2 grid steps per TensorCore so each core double-buffers its DMAs.
        cap = min(cap, max(1, bg // min(bg, 2 * cores)))
    bg_blk = _largest_divisor_at_most(bg, cap)   # exact divisor: no padded slabs
    num_blocks = bg // bg_blk

    vmem_limit = int(min(vmem_cap,
                         max(32 * 1024 * 1024,
                             bg_blk * per_bg_vmem + (2 << 20))))

    # --- free reshapes: no pad, no crop, no extra HBM passes -----------------
    xr = x.reshape(bg, cg, hw)
    w_bg = jnp.tile(jnp.reshape(weight, (groups,)).astype(jnp.float32), b)
    b_bg = jnp.tile(jnp.reshape(bias, (groups,)).astype(jnp.float32), b)
    w_bg = w_bg.reshape(num_blocks, bg_blk, 1)
    b_bg = b_bg.reshape(num_blocks, bg_blk, 1)

    # hw == 1 edge case: PyTorch's unbiased std is NaN there; we intentionally
    # return var = 0 (=> t = 0, gate = sigmoid(bias)) instead.
    inv_hw = 1.0 / hw
    inv_nm1 = 1.0 / max(hw - 1, 1)
    kernel = functools.partial(_sge_kernel, inv_hw=inv_hw, inv_nm1=inv_nm1)

    out = pl.pallas_call(
        kernel,
        out_shape=jax.ShapeDtypeStruct((bg, cg, hw), x.dtype),
        grid=(num_blocks,),
        in_specs=[
            pl.BlockSpec((bg_blk, cg, hw), lambda i: (i, 0, 0)),
            pl.BlockSpec((None, bg_blk, 1), lambda i: (i, 0, 0)),
            pl.BlockSpec((None, bg_blk, 1), lambda i: (i, 0, 0)),
        ],
        out_specs=pl.BlockSpec((bg_blk, cg, hw), lambda i: (i, 0, 0)),
        compiler_params=pltpu.CompilerParams(
            dimension_semantics=("parallel",),
            vmem_limit_bytes=vmem_limit),
        cost_estimate=pl.CostEstimate(
            flops=5 * bg * cg * hw,
            transcendentals=bg * hw,
            bytes_accessed=2 * bg * cg * hw * itemsize),
    )(xr, w_bg, b_bg)

    return out.reshape(b, c, h, w)


if __name__ == "__main__":
    key = jax.random.PRNGKey(0)
    kx, kw, kb = jax.random.split(key, 3)

    def check(name, x, weight, bias, groups, atol, rtol):
        out = jax.block_until_ready(
            spatial_group_enhance(x, weight, bias, groups))
        ref = sge_reference(x.astype(jnp.float32), weight, bias, groups)
        if not jnp.allclose(out.astype(jnp.float32), ref, atol=atol, rtol=rtol):
            raise AssertionError(f"{name} mismatch")

    # --- case 1: f32, lane-aligned spatial (16*16 = 256) --------------------
    b, c, h, w, groups = 2, 4, 16, 16, 2
    x = jax.random.normal(kx, (b, c, h, w), dtype=jnp.float32)
    # The PyTorch module initializes weight/bias to zeros; use small non-zero
    # values so the affine + sigmoid path is actually exercised.
    weight = 0.5 * jax.random.normal(kw, (1, groups, 1, 1), dtype=jnp.float32)
    bias = 0.1 * jax.random.normal(kb, (1, groups, 1, 1), dtype=jnp.float32)
    check("case 1 (f32, aligned)", x, weight, bias, groups, 1e-4, 1e-4)

    # --- case 2: f32, ragged spatial (7*7 = 49; masked tail store, no pad) --
    b2, c2, h2, w2, g2 = 2, 16, 7, 7, 4
    x2 = jax.random.normal(kx, (b2, c2, h2, w2), dtype=jnp.float32)
    w2p = 0.5 * jax.random.normal(kw, (1, g2, 1, 1), dtype=jnp.float32)
    b2p = 0.1 * jax.random.normal(kb, (1, g2, 1, 1), dtype=jnp.float32)
    check("case 2 (f32, ragged spatial)", x2, w2p, b2p, g2, 1e-4, 1e-4)

    # --- case 3: bf16 I/O (halves HBM bytes; compute stays f32 in-kernel) ---
    check("case 3 (bf16 I/O)", x.astype(jnp.bfloat16), weight, bias, groups,
          3e-2, 3e-2)

    # --- case 4: odd bg (b*groups = 9) and ragged spatial (5*9 = 45) --------
    b4, c4, h4, w4, g4 = 3, 12, 5, 9, 3
    x4 = jax.random.normal(kx, (b4, c4, h4, w4), dtype=jnp.float32)
    w4p = 0.5 * jax.random.normal(kw, (1, g4, 1, 1), dtype=jnp.float32)
    b4p = 0.1 * jax.random.normal(kb, (1, g4, 1, 1), dtype=jnp.float32)
    check("case 4 (odd bg, ragged spatial)", x4, w4p, b4p, g4, 1e-4, 1e-4)

    print("KERNEL_OK")
</pallas_src>

<mosaic_0001>
module attributes {stable_mosaic.version = 11 : i64} {
  func.func @_sge_kernel(%arg0: i32, %arg1: memref<4x2x256xf32, #tpu.memory_space<vmem>>, %arg2: memref<1x4x1xf32, #tpu.memory_space<vmem>>, %arg3: memref<1x4x1xf32, #tpu.memory_space<vmem>>, %arg4: memref<4x2x256xf32, #tpu.memory_space<vmem>>) attributes {dimension_semantics = [#tpu.dimension_semantics<parallel>], iteration_bounds = array<i64: 1>, scalar_prefetch = 0 : i64, scratch_operands = 0 : i64, tpu.core_type = #tpu.core_type<tc>, window_params = [{transform_indices = @transform_0, window_bounds = array<i64: 4, 2, 256>}, {transform_indices = @transform_1, window_bounds = array<i64: 1, 4, 1>}, {transform_indices = @transform_2, window_bounds = array<i64: 1, 4, 1>}, {transform_indices = @transform_3, window_bounds = array<i64: 4, 2, 256>}]} {
    %c0 = arith.constant 0 : index
    %c0_0 = arith.constant 0 : index
    %c0_1 = arith.constant 0 : index
    %0 = vector.load %arg1[%c0, %c0_0, %c0_1] : memref<4x2x256xf32, #tpu.memory_space<vmem>>, vector<4x2x256xf32>
    %cst = arith.constant dense<0.000000e+00> : vector<4x2xf32>
    %1 = vector.multi_reduction <add>, %0, %cst [2] : vector<4x2x256xf32> to vector<4x2xf32>
    %2 = vector.shape_cast %1 : vector<4x2xf32> to vector<4x2x1xf32>
    %cst_2 = arith.constant 3.906250e-03 : f32
    %3 = vector.broadcast %cst_2 : f32 to vector<4x2x1xf32>
    %4 = arith.mulf %2, %3 : vector<4x2x1xf32>
    %5 = vector.broadcast %4 : vector<4x2x1xf32> to vector<4x2x256xf32>
    %6 = arith.mulf %0, %5 : vector<4x2x256xf32>
    %cst_3 = arith.constant dense<0.000000e+00> : vector<4x256xf32>
    %7 = vector.multi_reduction <add>, %6, %cst_3 [1] : vector<4x2x256xf32> to vector<4x256xf32>
    %cst_4 = arith.constant dense<0.000000e+00> : vector<4xf32>
    %8 = vector.multi_reduction <add>, %7, %cst_4 [1] : vector<4x256xf32> to vector<4xf32>
    %9 = vector.shape_cast %8 : vector<4xf32> to vector<4x1xf32>
    %cst_5 = arith.constant 3.906250e-03 : f32
    %10 = vector.broadcast %cst_5 : f32 to vector<4x1xf32>
    %11 = arith.mulf %9, %10 : vector<4x1xf32>
    %12 = vector.broadcast %11 : vector<4x1xf32> to vector<4x256xf32>
    %13 = arith.subf %7, %12 : vector<4x256xf32>
    %14 = arith.mulf %13, %13 : vector<4x256xf32>
    %cst_6 = arith.constant dense<0.000000e+00> : vector<4xf32>
    %15 = vector.multi_reduction <add>, %14, %cst_6 [1] : vector<4x256xf32> to vector<4xf32>
    %16 = vector.shape_cast %15 : vector<4xf32> to vector<4x1xf32>
    %cst_7 = arith.constant 0.00392156886 : f32
    %17 = vector.broadcast %cst_7 : f32 to vector<4x1xf32>
    %18 = arith.mulf %16, %17 : vector<4x1xf32>
    %19 = math.sqrt %18 : vector<4x1xf32>
    %cst_8 = arith.constant 9.99999974E-6 : f32
    %20 = vector.broadcast %cst_8 : f32 to vector<4x1xf32>
    %21 = arith.addf %19, %20 : vector<4x1xf32>
    %22 = vector.broadcast %21 : vector<4x1xf32> to vector<4x256xf32>
    %23 = arith.divf %13, %22 : vector<4x256xf32>
    %c0_9 = arith.constant 0 : index
    %c0_10 = arith.constant 0 : index
    %c0_11 = arith.constant 0 : index
    %24 = vector.load %arg2[%c0_9, %c0_10, %c0_11] : memref<1x4x1xf32, #tpu.memory_space<vmem>>, vector<1x4x1xf32>
    %25 = vector.shape_cast %24 : vector<1x4x1xf32> to vector<4x1xf32>
    %c0_12 = arith.constant 0 : index
    %c0_13 = arith.constant 0 : index
    %c0_14 = arith.constant 0 : index
    %26 = vector.load %arg3[%c0_12, %c0_13, %c0_14] : memref<1x4x1xf32, #tpu.memory_space<vmem>>, vector<1x4x1xf32>
    %27 = vector.shape_cast %26 : vector<1x4x1xf32> to vector<4x1xf32>
    %28 = vector.broadcast %25 : vector<4x1xf32> to vector<4x256xf32>
    %29 = arith.mulf %23, %28 : vector<4x256xf32>
    %30 = vector.broadcast %27 : vector<4x1xf32> to vector<4x256xf32>
    %31 = arith.addf %29, %30 : vector<4x256xf32>
    %32 = arith.negf %31 : vector<4x256xf32>
    %33 = math.exp %32 : vector<4x256xf32>
    %cst_15 = arith.constant 1.000000e+00 : f32
    %34 = vector.broadcast %cst_15 : f32 to vector<4x256xf32>
    %35 = arith.addf %34, %33 : vector<4x256xf32>
    %36 = arith.divf %34, %35 : vector<4x256xf32>
    %c0_16 = arith.constant 0 : index
    %c0_17 = arith.constant 0 : index
    %c0_18 = arith.constant 0 : index
    %37 = vector.load %arg1[%c0_16, %c0_17, %c0_18] : memref<4x2x256xf32, #tpu.memory_space<vmem>>, vector<4x2x256xf32>
    %38 = vector.shape_cast %36 : vector<4x256xf32> to vector<4x1x256xf32>
    %39 = vector.broadcast %38 : vector<4x1x256xf32> to vector<4x2x256xf32>
    %40 = arith.mulf %37, %39 : vector<4x2x256xf32>
    %c0_19 = arith.constant 0 : index
    %c0_20 = arith.constant 0 : index
    %c0_21 = arith.constant 0 : index
    %41 = vector.load %arg4[%c0_19, %c0_20, %c0_21] : memref<4x2x256xf32, #tpu.memory_space<vmem>>, vector<4x2x256xf32>
    tpu.vector_store %arg4[%c0_19, %c0_20, %c0_21], %40 {strides = array<i32>} : memref<4x2x256xf32, #tpu.memory_space<vmem>>, vector<4x2x256xf32>,
    return
  }
  func.func @transform_0(%arg0: i32) -> (i32, i32, i32) {
    %c0_i32 = arith.constant 0 : i32
    %c0_i32_0 = arith.constant 0 : i32
    %c0_i32_1 = arith.constant 0 : i32
    return %arg0, %c0_i32, %c0_i32_0 : i32, i32, i32
  }
  func.func @transform_1(%arg0: i32) -> (i32, i32, i32) {
    %c0_i32 = arith.constant 0 : i32
    %c0_i32_0 = arith.constant 0 : i32
    %c0_i32_1 = arith.constant 0 : i32
    return %arg0, %c0_i32, %c0_i32_0 : i32, i32, i32
  }
  func.func @transform_2(%arg0: i32) -> (i32, i32, i32) {
    %c0_i32 = arith.constant 0 : i32
    %c0_i32_0 = arith.constant 0 : i32
    %c0_i32_1 = arith.constant 0 : i32
    return %arg0, %c0_i32, %c0_i32_0 : i32, i32, i32
  }
  func.func @transform_3(%arg0: i32) -> (i32, i32, i32) {
    %c0_i32 = arith.constant 0 : i32
    %c0_i32_0 = arith.constant 0 : i32
    %c0_i32_1 = arith.constant 0 : i32
    return %arg0, %c0_i32, %c0_i32_0 : i32, i32, i32
  }
}

</mosaic_0001>

<bundles_post_ra>
// kernel: tpu_custom_call.1
= control target key start
LH: loop header
LB: loop body
LE: loop exit
PB: predicated region body
PF: predicated region fallthrough
CT: control target
= control target key end

     0   :  { %8 = vsyncpa [#allocation3], 0  ;;  %s776_s0 = inlined_call_operand.hbm [shape: f32[4,2,256], index: 0, kind: input, shape index: {}]   ;;  %s777_s1 = inlined_call_operand.vmem [shape: f32[1,4,1], index: 1, kind: input, shape index: {}]   ;;  %s778_s2 = inlined_call_operand.vmem [shape: f32[1,4,1], index: 2, kind: input, shape index: {}]   ;;  %s779_s3 = inlined_call_operand.hbm [shape: f32[4,2,256], index: 3, kind: output, shape index: {}]  }
   0x1   :  { %9 = vsyncpa [#allocation4], 0  ;;  %s640_s12 = smov [#allocation2]  }
   0x2   :  { %s15_s13 = sshll.u32 %s640_s12, 4  ;;  %s16_s13 = int_to_ptr.vmem [resolvable:$true] %s15_s13 }
   0x3   :  { %s604_s14 = scalar_lea.vmem %s16_s13, 256  ;;  %p609_p1 = scmp.lt.s32.totalorder %s16_s13, %s16_s13 }
   0x4   :  { %p605_p0 = scmp.ne.s32.totalorder %s16_s13, %s604_s14  ;;  %p610_p2 = scmp.lt.s32.totalorder %s604_s14, %s604_s14 }
   0x6   :  { %p611_p3 = por %p610_p2, %p609_p1 }
   0x8   :  { %p612_p4 = pnand %p611_p3, %p605_p0 }
   0xa   :  { %615 = shalt.err (!%p612_p4)
}
   0xb   :  { %s641_s15 = smov 64   ;;  %s642_s16 = smov 4  }
   0xc   :  { %21 = dma.hbm_to_vmem [thread:$0]  %s776_s0, 256, %s16_s13, [#allocation3], %s641_s15, %s641_s15, %s642_s16  }
   0xd   :  { %636 = dma.done.wait [#allocation3], 256  }
   0xe   :  { %637 = vsyncadd [#allocation3], 4294967040  ;;  %v40_v0 = vlaneseq  ;;  %v643_v1 = vmov 1983009808   ;;  %vm77_vm0 = vcmask 1041408   ;;  %vm250_vm1 = vcmask 1041409  }
   0xf   :  { %v38_v2 = vunpack.c.l.s4 %v643_v1  ;;  %v678_v6 = vld [vmem:[#allocation2 + $0x8] sm:$0xf]  ;;  %v680_v7 = vld [vmem:[#allocation2] sm:$0xf]  ;;  %v682_v8 = vld [vmem:[#allocation2 + $0xc] sm:$0xf] }
  0x10   :  { %v673_v3 = vshrl.u32 %v40_v0, 7  ;;  %v690_v12 = vld [vmem:[#allocation2 + $0x4] sm:$0xf]  ;;  %v644_v30 = vmov 269488144   ;;  %vm252_vm2 = vcmask 1042434  }
  0x11   :  { %v39_v4 = vunpack.c.0.s8 %v38_v2  ;;  %v107_v31 = vunpack.c.l.s4 %v644_v30  ;;  %vm254_vm3 = vcmask 1043459   ;;  %vm261_vm4 = vcmask 1043456  }
  0x13   :  { %v676_v5 = vsub.s32 %v39_v4, %v673_v3  ;;  %v108_v32 = vunpack.c.0.s8 %v107_v31 }
  0x15   :  { %v59_v9 = vrot.slane %v678_v6, %v676_v5  ;;  %v43_v10 = vrot.slane %v680_v7, %v676_v5  ;;  %v67_v11 = vrot.slane %v682_v8, %v676_v5  ;;  %v51_v13 = vrot.slane %v690_v12, %v676_v5 }
  0x16   :  { %v111_v33 = vsub.s32 %v108_v32, %v673_v3 }
  0x17   :  { %v60_v14 = vcombine.high %v59_v9, %v59_v9  ;;  %v88_v15 = vsel %vm77_vm0, %v59_v9, 0.0  ;;  %v44_v16 = vcombine.high %v43_v10, %v43_v10  ;;  %v78_v17 = vsel %vm77_vm0, %v43_v10, 0.0 }
  0x18   :  { %v68_v18 = vcombine.high %v67_v11, %v67_v11  ;;  %v52_v19 = vcombine.high %v51_v13, %v51_v13  ;;  %v93_v22 = vsel %vm77_vm0, %v67_v11, 0.0  ;;  %v83_v23 = vsel %vm77_vm0, %v51_v13, 0.0 }
  0x19   :  { %v89_v20 = vsel %vm77_vm0, %v60_v14, 0.0  ;;  %v79_v21 = vsel %vm77_vm0, %v44_v16, 0.0 }
  0x1a   :  { %v90_v24 = vadd.f32 %v89_v20, %v88_v15  ;;  %v80_v25 = vadd.f32 %v79_v21, %v78_v17  ;;  %v94_v26 = vsel %vm77_vm0, %v68_v18, 0.0  ;;  %v84_v27 = vsel %vm77_vm0, %v52_v19, 0.0 }
  0x1b   :  { %v95_v28 = vadd.f32 %v94_v26, %v93_v22  ;;  %v85_v29 = vadd.f32 %v84_v27, %v83_v23 }
  0x1c   :  { %91 = vadd.xlane.f32.xlu1 %v90_v24  ;;  %81 = vadd.xlane.f32.xlu0 %v80_v25 }
  0x20   :  { %96 = vadd.xlane.f32.xlu1 %v95_v28  ;;  %86 = vadd.xlane.f32.xlu0 %v85_v29 }
  0xa5   :  { %v92_v34 = vpop.xlane.xlu1 %91  ;;  %v82_v35 = vpop.xlane.xlu0 %81 }
  0xa6   :  { %v100_v36 = vmul.f32 0.00390625, %v92_v34  ;;  %v98_v37 = vmul.f32 0.00390625, %v82_v35 }
  0xa8   :  { %v126_v38 = vrot.slane %v100_v36, %v111_v33  ;;  %v112_v39 = vrot.slane %v98_v37, %v111_v33 }
  0xa9   :  { %v97_v40 = vpop.xlane.xlu1 %96  ;;  %v87_v41 = vpop.xlane.xlu0 %86 }
  0xaa   :  { %v140_v42 = vmul.f32 %v126_v38, %v678_v6  ;;  %v138_v43 = vmul.f32 %v112_v39, %v680_v7  ;;  %v101_v44 = vmul.f32 0.00390625, %v97_v40  ;;  %v99_v45 = vmul.f32 0.00390625, %v87_v41 }
  0xac   :  { %v168_v46 = vrot.slane %v140_v42, %v676_v5  ;;  %v152_v47 = vrot.slane %v138_v43, %v676_v5  ;;  %v133_v48 = vrot.slane %v101_v44, %v111_v33  ;;  %v119_v49 = vrot.slane %v99_v45, %v111_v33 }
  0xae   :  { %v169_v50 = vcombine.high %v168_v46, %v168_v46  ;;  %v214_v51 = vsel %vm77_vm0, %v168_v46, 0.0  ;;  %v153_v52 = vcombine.high %v152_v47, %v152_v47  ;;  %v186_v53 = vsel %vm77_vm0, %v152_v47, 0.0 }
  0xaf   :  { %v215_v54 = vrot.slane %v214_v51, 4  ;;  %v187_v55 = vrot.slane %v186_v53, 4  ;;  %v141_v56 = vmul.f32 %v133_v48, %v682_v8  ;;  %v139_v57 = vmul.f32 %v119_v49, %v690_v12 }
  0xb0   :  { %v221_v58 = vsel %vm77_vm0, %v169_v50, 0.0  ;;  %v193_v59 = vsel %vm77_vm0, %v153_v52, 0.0 }
  0xb1   :  { %v216_v60 = vadd.f32 %v215_v54, %v214_v51  ;;  %v222_v61 = vrot.slane %v221_v58, 4  ;;  %v188_v62 = vadd.f32 %v187_v55, %v186_v53  ;;  %v194_v63 = vrot.slane %v193_v59, 4 }
  0xb2   :  { %v176_v0 = vrot.slane %v141_v56, %v676_v5  ;;  %v160_v1 = vrot.slane %v139_v57, %v676_v5 }
  0xb3   :  { %v223_v2 = vadd.f32 %v222_v61, %v221_v58  ;;  %v189_v4 = vrot.slane %v188_v62, 2  ;;  %v195_v9 = vadd.f32 %v194_v63, %v193_v59  ;;  %v217_v15 = vrot.slane %v216_v60, 2 }
  0xb4   :  { %v177_v10 = vcombine.high %v176_v0, %v176_v0  ;;  %v228_v11 = vsel %vm77_vm0, %v176_v0, 0.0  ;;  %v161_v13 = vcombine.high %v160_v1, %v160_v1  ;;  %v200_v14 = vsel %vm77_vm0, %v160_v1, 0.0  ;;  %v348_v1 = vld [vmem:[%s777_s1] sm:$0xf] }
  0xb5   :  { %v224_v16 = vrot.slane %v223_v2, 2  ;;  %v196_v17 = vrot.slane %v195_v9, 2  ;;  %v229_v18 = vrot.slane %v228_v11, 4  ;;  %v201_v20 = vrot.slane %v200_v14, 4 }
  0xb6   :  { %v235_v19 = vsel %vm77_vm0, %v177_v10, 0.0  ;;  %v207_v21 = vsel %vm77_vm0, %v161_v13, 0.0  ;;  %v190_v24 = vadd.f32 %v189_v4, %v188_v62  ;;  %v218_v27 = vadd.f32 %v217_v15, %v216_v60 }
  0xb7   :  { %v236_v22 = vrot.slane %v235_v19, 4  ;;  %v208_v23 = vrot.slane %v207_v21, 4  ;;  %v230_v25 = vadd.f32 %v229_v18, %v228_v11  ;;  %v202_v26 = vadd.f32 %v201_v20, %v200_v14 }
  0xb8   :  { %v197_v28 = vadd.f32 %v196_v17, %v195_v9  ;;  %v225_v33 = vadd.f32 %v224_v16, %v223_v2  ;;  %v191_v36 = vrot.slane %v190_v24, 1  ;;  %v219_v41 = vrot.slane %v218_v27, 1 }
  0xb9   :  { %v237_v29 = vadd.f32 %v236_v22, %v235_v19  ;;  %v209_v30 = vadd.f32 %v208_v23, %v207_v21  ;;  %v231_v31 = vrot.slane %v230_v25, 2  ;;  %v203_v32 = vrot.slane %v202_v26, 2 }
  0xba   :  { %v198_v40 = vrot.slane %v197_v28, 1  ;;  %v226_v44 = vrot.slane %v225_v33, 1  ;;  %v192_v48 = vadd.f32 %v191_v36, %v190_v24  ;;  %v220_v52 = vadd.f32 %v219_v41, %v218_v27 }
  0xbb   :  { %v210_v34 = vrot.slane %v209_v30, 2  ;;  %v238_v35 = vrot.slane %v237_v29, 2  ;;  %v204_v37 = vadd.f32 %v203_v32, %v202_v26  ;;  %v232_v38 = vadd.f32 %v231_v31, %v230_v25 }
  0xbc   :  { %v199_v50 = vadd.f32 %v198_v40, %v197_v28  ;;  %v227_v53 = vadd.f32 %v226_v44, %v225_v33  ;;  %v645_v2 = vmov 0  }
  0xbd   :  { %v211_v39 = vadd.f32 %v210_v34, %v209_v30  ;;  %v239_v42 = vadd.f32 %v238_v35, %v237_v29  ;;  %v205_v43 = vrot.slane %v204_v37, 1  ;;  %v233_v45 = vrot.slane %v232_v38, 1  ;;  %552 = vset.pattern.permute.xlu0 %v645_v2  ;;  %553 = vset.pattern.permute.xlu1 %v645_v2 }
  0xbf   :  { %v212_v46 = vrot.slane %v211_v39, 1  ;;  %v240_v47 = vrot.slane %v239_v42, 1  ;;  %v206_v49 = vadd.f32 %v205_v43, %v204_v37  ;;  %v234_v54 = vadd.f32 %v233_v45, %v232_v38  ;;  %v349_v45 = vld [vmem:[%s778_s2] sm:$0xf]  ;;  %s646_s2 = smov [#allocation5]  }
  0xc0   :  { %s525_s21 = sshll.u32 %s646_s2, 4  ;;  %s526_s21 = int_to_ptr.vmem [resolvable:$true] %s525_s21 }
  0xc1   :  { %v213_v51 = vadd.f32 %v212_v46, %v211_v39  ;;  %v251_v55 = vsel %vm250_vm1, %v206_v49, %v192_v48  ;;  %v241_v56 = vadd.f32 %v240_v47, %v239_v42  ;;  %s616_s22 = scalar_lea.vmem %s526_s21, 256  ;;  %p621_p6 = scmp.lt.s32.totalorder %s526_s21, %s526_s21 }
  0xc2   :  { %v253_v57 = vsel %vm252_vm2, %v220_v52, %v251_v55  ;;  %p617_p5 = scmp.ne.s32.totalorder %s526_s21, %s616_s22  ;;  %p622_p7 = scmp.lt.s32.totalorder %s616_s22, %s616_s22 }
  0xc3   :  { %v256_v58 = vsel %vm250_vm1, %v213_v51, %v199_v50  ;;  %v255_v59 = vsel %vm254_vm3, %v234_v54, %v253_v57 }
  0xc4   :  { %v257_v60 = vsel %vm252_vm2, %v227_v53, %v256_v58  ;;  %v262_v62 = vsel %vm261_vm4, %v255_v59, 0.0  ;;  %p623_p8 = por %p622_p7, %p621_p6 }
  0xc5   :  { %v258_v61 = vsel %vm254_vm3, %v241_v56, %v257_v60 }
  0xc6   :  { %v263_v63 = vsel %vm261_vm4, %v258_v61, 0.0  ;;  %p624_p9 = pnand %p623_p8, %p617_p5 }
  0xc7   :  { %v264_v0 = vadd.f32 %v263_v63, %v262_v62 }
  0xc9   :  { %265 = vadd.xlane.f32.xlu0 %v264_v0 }
  0xdf   :  { %352 = vperm.xlu0 %552, %v348_v1  }
 0x152   :  { %v266_v4 = vpop.xlane.xlu0 %265 }
 0x153   :  { %v267_v9 = vmul.f32 0.00390625, %v266_v4 }
 0x155   :  { %v269_v10 = vrot.slane %v267_v9, 1  ;;  %v270_v11 = vrot.slane %v267_v9, 2  ;;  %v276_v13 = vsub.f32 %v192_v48, %v267_v9  ;;  %v277_v14 = vsub.f32 %v199_v50, %v267_v9 }
 0x156   :  { %v271_v15 = vrot.slane %v267_v9, 3 }
 0x157   :  { %v278_v16 = vsub.f32 %v206_v49, %v269_v10  ;;  %v279_v17 = vsub.f32 %v213_v51, %v269_v10  ;;  %v730_v18 = vsub.f32 %v220_v52, %v270_v11  ;;  %v732_v19 = vsub.f32 %v227_v53, %v270_v11 }
 0x158   :  { %v734_v20 = vsub.f32 %v234_v54, %v271_v15  ;;  %v736_v21 = vsub.f32 %v241_v56, %v271_v15  ;;  %v284_v26 = vmul.f32 %v276_v13, %v276_v13  ;;  %v285_v27 = vmul.f32 %v277_v14, %v277_v14 }
 0x159   :  { %v286_v22 = vmul.f32 %v278_v16, %v278_v16  ;;  %v287_v23 = vmul.f32 %v279_v17, %v279_v17  ;;  %v288_v24 = vmul.f32 %v730_v18, %v730_v18  ;;  %v289_v25 = vmul.f32 %v732_v19, %v732_v19 }
 0x15a   :  { %v290_v28 = vmul.f32 %v734_v20, %v734_v20  ;;  %v291_v29 = vmul.f32 %v736_v21, %v736_v21  ;;  %v353_v57 = vpop.permute.xlu0 %352 }
 0x15b   :  { %v300_v30 = vrot.slane %v286_v22, 7  ;;  %v302_v31 = vrot.slane %v288_v24, 6  ;;  %v306_v32 = vrot.slane %v287_v23, 7  ;;  %v308_v33 = vrot.slane %v289_v25, 6 }
 0x15c   :  { %v304_v35 = vrot.slane %v290_v28, 5  ;;  %v310_v37 = vrot.slane %v291_v29, 5  ;;  %v354_v62 = vrot.slane %v353_v57, 1  ;;  %v355_v0 = vrot.slane %v353_v57, 2 }
 0x15d   :  { %v301_v34 = vsel %vm250_vm1, %v300_v30, %v284_v26  ;;  %v307_v36 = vsel %vm250_vm1, %v306_v32, %v285_v27  ;;  %v356_v1 = vrot.slane %v353_v57, 3 }
 0x15e   :  { %v303_v38 = vsel %vm252_vm2, %v302_v31, %v301_v34  ;;  %v309_v39 = vsel %vm252_vm2, %v308_v33, %v307_v36 }
 0x15f   :  { %v305_v40 = vsel %vm254_vm3, %v304_v35, %v303_v38  ;;  %v311_v41 = vsel %vm254_vm3, %v310_v37, %v309_v39 }
 0x160   :  { %v314_v42 = vsel %vm261_vm4, %v305_v40, 0.0  ;;  %v315_v43 = vsel %vm261_vm4, %v311_v41, 0.0 }
 0x161   :  { %v316_v44 = vadd.f32 %v315_v43, %v314_v42 }
 0x163   :  { %317 = vadd.xlane.f32.xlu1 %v316_v44 }
 0x174   :  { %371 = vperm.xlu1 %553, %v349_v45  }
 0x1ec   :  { %v318_v46 = vpop.xlane.xlu1 %317 }
 0x1ed   :  { %v319_v47 = vmul.f32 0.003921569, %v318_v46 }
 0x1ef   :  { %554 = vrsqrt.f32 %v319_v47  ;;  %vm322_vm5 = vcmp.eq.f32.partialorder %v319_v47, inf  ;;  %v325_v50 = vand.u32 2147483648, %v319_v47  ;;  %vm324_vm6 = vcmp.eq.f32.partialorder %v319_v47, 0.0 }
 0x1f0   :  { %v372_v58 = vpop.permute.xlu1 %371 }
 0x1f1   :  { %v373_v2 = vrot.slane %v372_v58, 1  ;;  %v374_v25 = vrot.slane %v372_v58, 2  ;;  %v375_v26 = vrot.slane %v372_v58, 3 }
 0x1fc   :  { %v555_v48 = vpop.eup %554 }
 0x1fd   :  { %v321_v49 = vmul.f32 %v555_v48, %v319_v47 }
 0x1ff   :  { %v323_v51 = vsel %vm322_vm5, %v319_v47, %v321_v49 }
 0x200   :  { %v326_v52 = vsel %vm324_vm6, %v325_v50, %v323_v51 }
 0x201   :  { %v327_v53 = vadd.f32 1e-05, %v326_v52 }
 0x203   :  { %v329_v54 = vrot.slane %v327_v53, 1  ;;  %v330_v55 = vrot.slane %v327_v53, 2  ;;  %v331_v56 = vrot.slane %v327_v53, 3  ;;  %556 = vrcp.f32 %v327_v53 }
 0x205   :  { %558 = vrcp.f32 %v329_v54 }
 0x206   :  { %560 = vrcp.f32 %v330_v55 }
 0x207   :  { %562 = vrcp.f32 %v331_v56 }
 0x210   :  { %v557_v59 = vpop.eup %556 }
 0x211   :  { %v337_v60 = vmul.f32 %v557_v59, %v276_v13  ;;  %v338_v61 = vmul.f32 %v557_v59, %v277_v14  ;;  %v438_v59 = vsub.s32 0, %v673_v3 }
 0x212   :  { %v559_v63 = vpop.eup %558 }
 0x213   :  { %v561_v4 = vpop.eup %560  ;;  %v340_v9 = vmul.f32 %v559_v63, %v278_v16  ;;  %v341_v10 = vmul.f32 %v559_v63, %v279_v17  ;;  %v361_v11 = vmul.f32 %v353_v57, %v337_v60  ;;  %v362_v15 = vmul.f32 %v353_v57, %v338_v61 }
 0x214   :  { %v563_v22 = vpop.eup %562  ;;  %v343_v23 = vmul.f32 %v561_v4, %v730_v18  ;;  %v344_v24 = vmul.f32 %v561_v4, %v732_v19 }
 0x215   :  { %v346_v13 = vmul.f32 %v563_v22, %v734_v20  ;;  %v347_v14 = vmul.f32 %v563_v22, %v736_v21  ;;  %v363_v27 = vmul.f32 %v354_v62, %v340_v9  ;;  %v364_v28 = vmul.f32 %v354_v62, %v341_v10 }
 0x216   :  { %v365_v29 = vmul.f32 %v355_v0, %v343_v23  ;;  %v366_v30 = vmul.f32 %v355_v0, %v344_v24  ;;  %v380_v31 = vadd.f32 %v372_v58, %v361_v11  ;;  %v381_v16 = vadd.f32 %v372_v58, %v362_v15 }
 0x217   :  { %v367_v17 = vmul.f32 %v356_v1, %v346_v13  ;;  %v368_v32 = vmul.f32 %v356_v1, %v347_v14  ;;  %v382_v33 = vadd.f32 %v373_v2, %v363_v27  ;;  %v383_v34 = vadd.f32 %v373_v2, %v364_v28 }
 0x218   :  { %v384_v35 = vadd.f32 %v374_v25, %v365_v29  ;;  %v385_v18 = vadd.f32 %v374_v25, %v366_v30  ;;  %v537_v36 = vmul.f32 -1.442695, %v380_v31  ;;  %v538_v19 = vmul.f32 -1.442695, %v381_v16 }
 0x219   :  { %v386_v37 = vadd.f32 %v375_v26, %v367_v17  ;;  %v387_v38 = vadd.f32 %v375_v26, %v368_v32  ;;  %v539_v39 = vmul.f32 -1.442695, %v382_v33  ;;  %v540_v20 = vmul.f32 -1.442695, %v383_v34 }
 0x21a   :  { %564 = vpow2.f32 %v537_v36  ;;  %v541_v21 = vmul.f32 -1.442695, %v384_v35  ;;  %v542_v40 = vmul.f32 -1.442695, %v385_v18 }
 0x21b   :  { %566 = vpow2.f32 %v538_v19  ;;  %v543_v41 = vmul.f32 -1.442695, %v386_v37  ;;  %v544_v42 = vmul.f32 -1.442695, %v387_v38 }
 0x21c   :  { %568 = vpow2.f32 %v539_v39 }
 0x21d   :  { %570 = vpow2.f32 %v540_v20 }
 0x21e   :  { %572 = vpow2.f32 %v541_v21 }
 0x21f   :  { %574 = vpow2.f32 %v542_v40 }
 0x220   :  { %576 = vpow2.f32 %v543_v41 }
 0x221   :  { %578 = vpow2.f32 %v544_v42 }
 0x227   :  { %v565_v43 = vpop.eup %564 }
 0x228   :  { %v567_v44 = vpop.eup %566  ;;  %v412_v45 = vadd.f32 1.0, %v565_v43 }
 0x229   :  { %v569_v46 = vpop.eup %568  ;;  %v413_v47 = vadd.f32 1.0, %v567_v44 }
 0x22a   :  { %v571_v48 = vpop.eup %570  ;;  %v414_v49 = vadd.f32 1.0, %v569_v46  ;;  %580 = vrcp.f32 %v412_v45 }
 0x22b   :  { %v573_v50 = vpop.eup %572  ;;  %v415_v51 = vadd.f32 1.0, %v571_v48  ;;  %582 = vrcp.f32 %v413_v47 }
 0x22c   :  { %v575_v52 = vpop.eup %574  ;;  %v416_v53 = vadd.f32 1.0, %v573_v50  ;;  %584 = vrcp.f32 %v414_v49 }
 0x22d   :  { %v577_v54 = vpop.eup %576  ;;  %v417_v55 = vadd.f32 1.0, %v575_v52  ;;  %586 = vrcp.f32 %v415_v51 }
 0x22e   :  { %v579_v56 = vpop.eup %578  ;;  %v418_v57 = vadd.f32 1.0, %v577_v54  ;;  %588 = vrcp.f32 %v416_v53 }
 0x22f   :  { %v419_v58 = vadd.f32 1.0, %v579_v56  ;;  %590 = vrcp.f32 %v417_v55 }
 0x230   :  { %592 = vrcp.f32 %v418_v57 }
 0x231   :  { %594 = vrcp.f32 %v419_v58 }
 0x237   :  { %v581_v60 = vpop.eup %580 }
 0x238   :  { %v583_v61 = vpop.eup %582  ;;  %v439_v62 = vrot.slane %v581_v60, %v438_v59 }
 0x239   :  { %v585_v63 = vpop.eup %584  ;;  %v443_v0 = vrot.slane %v583_v61, %v438_v59 }
 0x23a   :  { %v587_v1 = vpop.eup %586  ;;  %v447_v2 = vrot.slane %v585_v63, %v438_v59 }
 0x23b   :  { %v589_v4 = vpop.eup %588  ;;  %v451_v9 = vrot.slane %v587_v1, %v438_v59  ;;  %v476_v10 = vcombine.low %v439_v62, %v443_v0 }
 0x23c   :  { %v591_v11 = vpop.eup %590  ;;  %v455_v15 = vrot.slane %v589_v4, %v438_v59 }
 0x23d   :  { %v593_v22 = vpop.eup %592  ;;  %v459_v23 = vrot.slane %v591_v11, %v438_v59  ;;  %v483_v24 = vrot.slane %v476_v10, %v676_v5  ;;  %v484_v25 = vcombine.low %v447_v2, %v451_v9 }
 0x23e   :  { %v595_v26 = vpop.eup %594  ;;  %v463_v13 = vrot.slane %v593_v22, %v438_v59 }
 0x23f   :  { %v467_v3 = vrot.slane %v595_v26, %v438_v59  ;;  %v491_v14 = vrot.slane %v484_v25, %v676_v5  ;;  %v492_v27 = vcombine.low %v455_v15, %v459_v23  ;;  %v512_v28 = vmul.f32 %v483_v24, %v680_v7 }
 0x241   :  { %v499_v29 = vrot.slane %v492_v27, %v676_v5  ;;  %v500_v30 = vcombine.low %v463_v13, %v467_v3  ;;  %v513_v31 = vmul.f32 %v491_v14, %v690_v12  ;;  %516 = vst [vmem:[#allocation5] sm:$0xf] %v512_v28 }
 0x243   :  { %v507_v16 = vrot.slane %v500_v30, %v676_v5  ;;  %v514_v17 = vmul.f32 %v499_v29, %v678_v6  ;;  %517 = vst [vmem:[#allocation5 + $0x4] sm:$0xf] %v513_v31 }
 0x245   :  { %v515_v32 = vmul.f32 %v507_v16, %v682_v8  ;;  %518 = vst [vmem:[#allocation5 + $0x8] sm:$0xf] %v514_v17 }
 0x247   :  { %519 = vst [vmem:[#allocation5 + $0xc] sm:$0xf] %v515_v32 }
 0x248   :  { %627 = shalt.err (!%p624_p9)
}
 0x249   :  { %531 = dma.vmem_to_hbm [thread:$0]  %s526_s21, 256, %s779_s3, [#allocation4], %s641_s15, %s641_s15, %s642_s16  }
 0x24a   :  { %638 = dma.done.wait [#allocation4], 256  }
 0x24b   :  { %639 = vsyncadd [#allocation4], 4294967040 }
 0x24c   :  { %535 = vsyncpa [#allocation3], 1 }
 0x24d   :  { %536 = vsyncpa [#allocation4], 1 }

</bundles_post_ra>
